<compile_context>
chip_gen: v6e
topology: v6e:2x2x1
jax: 0.10.0
libtpu: 0.0.40
codegen_flags: <defaults>
</compile_context>

<pallas_src>
import jax
import jax.numpy as jnp
from jax.experimental import pallas as pl
from jax.experimental.pallas import tpu as pltpu


def _round_up(x: int, m: int) -> int:
    return (x + m - 1) // m * m


def _cdiv(a: int, b: int) -> int:
    return -(-a // b)


# minimum second-minor (sublane) tile multiple per itemsize
_SUBLANE = {4: 8, 2: 16, 1: 32}


# ----------------------------------------------------------------------------
# One-time parameter preparation (do NOT rebuild per forward call).
# ----------------------------------------------------------------------------
def prepare_params(params, seq_len, weight_dtype=jnp.float32):
    """Pad hidden to 128 lanes, build the seq-tiled proj_in weight for the
    large-batch fused path, and cast weights to `weight_dtype` (pass
    jnp.bfloat16 when activations are bf16 so the MXU stays on the native
    bf16 x bf16 -> f32 path).  Biases stay f32 (added to f32 accumulators)."""
    hidden = params["w_in"].shape[1]
    H_pad = _round_up(hidden, 128)
    ph = H_pad - hidden
    f32 = jnp.float32

    w_in_p = jnp.pad(params["w_in"].astype(weight_dtype), ((0, 0), (0, ph)))
    return {
        "hidden": hidden,
        "H_pad": H_pad,
        "seq_len": seq_len,
        "w_in": w_in_p,                                # (d_in, H_pad)     unfused path
        "w_in_rep": jnp.tile(w_in_p, (seq_len, 1)),    # (seq*d_in, H_pad) fused path
        "b_in": jnp.pad(params["b_in"].astype(f32), ((0, 0), (0, ph))),
        "w_mid": jnp.pad(params["w_mid"].astype(weight_dtype), ((0, ph), (0, ph))),
        "b_mid": jnp.pad(params["b_mid"].astype(f32), ((0, 0), (0, ph))),
        "w_out": jnp.pad(params["w_out"].astype(weight_dtype), ((0, ph), (0, ph))),
        "b_out": jnp.pad(params["b_out"].astype(f32), ((0, 0), (0, ph))),
    }


# ----------------------------------------------------------------------------
# Kernel bodies
# ----------------------------------------------------------------------------
def _make_kernel(sigmoid_output: bool, fused: bool):
    def kernel(x_ref, w_in_ref, b_in_ref, w_mid_ref, b_mid_ref,
               w_out_ref, b_out_ref, o_ref):
        w_dtype = w_in_ref.dtype
        if fused:
            # x block: (Bt, seq*d_in).  proj_in weight is seq-tiled along K, so
            # this single MXU matmul performs sum-over-seq + proj_in at once.
            h = jnp.dot(x_ref[...].astype(w_dtype), w_in_ref[...],
                        preferred_element_type=jnp.float32)
        else:
            # x block: (Bt, seq, d_in).  Reduce seq in f32 (matches reference),
            # then contract with the untiled proj_in weight.
            s = jnp.sum(x_ref[...].astype(jnp.float32), axis=1)
            h = jnp.dot(s.astype(w_dtype), w_in_ref[...],
                        preferred_element_type=jnp.float32)

        h = jnp.maximum(h + b_in_ref[...], 0.0)                    # proj_in bias + ReLU

        h = jnp.dot(h.astype(w_dtype), w_mid_ref[...],             # middle layer
                    preferred_element_type=jnp.float32)
        h = jnp.maximum(h + b_mid_ref[...], 0.0)

        h = jnp.dot(h.astype(w_dtype), w_out_ref[...],             # proj_out
                    preferred_element_type=jnp.float32)
        h = h + b_out_ref[...]

        if sigmoid_output:
            h = jax.nn.sigmoid(h)                                  # EUP slot

        o_ref[...] = h.astype(o_ref.dtype)                         # lane-dense store
    return kernel


# ----------------------------------------------------------------------------
# Forward
# ----------------------------------------------------------------------------
def text_embedding_mlp(token_embedding, prepped, sigmoid_output: bool = False,
                       *, fuse_batch_threshold: int = 64, bt_max: int = 1024,
                       vmem_budget_bytes: int = 12 * (1 << 20)):
    """token_embedding: (bs, seq_len, input_dim) -> (bs, 1, hidden)."""
    bs, seq_len, d_in = token_embedding.shape
    assert seq_len == prepped["seq_len"], "prepare_params() seq_len mismatch"
    hidden, H_pad = prepped["hidden"], prepped["H_pad"]
    out_dtype = token_embedding.dtype
    itemsize = jnp.dtype(out_dtype).itemsize
    w_itemsize = jnp.dtype(prepped["w_in"].dtype).itemsize
    mult = _SUBLANE.get(itemsize, 8)
    K = seq_len * d_in

    # Fused (seq folded into the proj_in MXU matmul, seq-tiled weight) only when
    # the batch is big enough to amortize the replicated weight AND it fits VMEM.
    fused_w_bytes = 2 * K * H_pad * w_itemsize  # default double-buffering
    fused = (bs > fuse_batch_threshold) and (fused_w_bytes < vmem_budget_bytes // 2)

    if not fused and bs <= fuse_batch_threshold:
        # Tiny batch: one block covering the full arrays -> no padding, no copies.
        bt, grid = bs, (1,)
    else:
        bt = min(bt_max, _round_up(bs, mult))

        def vmem_bytes(b):
            act = b * K * itemsize
            outb = b * H_pad * itemsize
            w = ((K if fused else d_in) * H_pad + 2 * H_pad * H_pad) * w_itemsize \
                + 3 * H_pad * 4
            return 2 * (act + outb + w)        # double-buffered everything

        while bt > mult and vmem_bytes(bt) > vmem_budget_bytes:
            bt = max(mult, (bt // 2) // mult * mult)
        # v7x megacore: make sure the grid has >= 2 steps so both TCs get work.
        if _cdiv(bs, bt) < 2 and bs > 2 * mult:
            bt = max(mult, _round_up(_cdiv(bs, 2), mult))
        grid = (_cdiv(bs, bt),)                # ragged last block handled by Pallas

    if fused:
        x_arg = token_embedding.reshape(bs, K)          # contiguous reshape (free)
        x_spec = pl.BlockSpec((bt, K), lambda i: (i, 0))
        w_in_arg = prepped["w_in_rep"]
        w_in_spec = pl.BlockSpec((K, H_pad), lambda i: (0, 0))
    else:
        x_arg = token_embedding
        x_spec = pl.BlockSpec((bt, seq_len, d_in), lambda i: (i, 0, 0))
        w_in_arg = prepped["w_in"]
        w_in_spec = pl.BlockSpec((d_in, H_pad), lambda i: (0, 0))

    const2 = lambda i: (0, 0)                           # weight/bias resident in VMEM
    out = pl.pallas_call(
        _make_kernel(sigmoid_output, fused),
        out_shape=jax.ShapeDtypeStruct((bs, H_pad), out_dtype),
        grid=grid,
        in_specs=[
            x_spec,                                     # activations: pipelined
            w_in_spec,
            pl.BlockSpec((1, H_pad), const2),
            pl.BlockSpec((H_pad, H_pad), const2),
            pl.BlockSpec((1, H_pad), const2),
            pl.BlockSpec((H_pad, H_pad), const2),
            pl.BlockSpec((1, H_pad), const2),
        ],
        out_specs=pl.BlockSpec((bt, H_pad), lambda i: (i, 0)),
        compiler_params=pltpu.CompilerParams(
            dimension_semantics=("parallel",)),         # megacore batch split
    )(x_arg, w_in_arg, prepped["b_in"], prepped["w_mid"], prepped["b_mid"],
      prepped["w_out"], prepped["b_out"])

    # Drop lane padding, then unsqueeze(1): (bs, hidden) -> (bs, 1, hidden).
    return out[:, :hidden][:, None, :]


# ----------------------------------------------------------------------------
# Synthetic params + pure-JAX reference
# ----------------------------------------------------------------------------
def init_params(key, input_dim, hidden):
    """Deterministic synthetic parameters. Weights stored as (in, out)."""
    ks = jax.random.split(key, 6)
    scale = 0.02
    return {
        "w_in":  scale * jax.random.normal(ks[0], (input_dim, hidden), jnp.float32),
        "b_in":  scale * jax.random.normal(ks[1], (1, hidden), jnp.float32),
        "w_mid": scale * jax.random.normal(ks[2], (hidden, hidden), jnp.float32),
        "b_mid": scale * jax.random.normal(ks[3], (1, hidden), jnp.float32),
        "w_out": scale * jax.random.normal(ks[4], (hidden, hidden), jnp.float32),
        "b_out": scale * jax.random.normal(ks[5], (1, hidden), jnp.float32),
    }


def reference(token_embedding, params, sigmoid_output=False):
    """Pure-JAX reference mirroring the PyTorch forward."""
    s = jnp.sum(token_embedding.astype(jnp.float32), axis=1)
    h = jax.nn.relu(s @ params["w_in"] + params["b_in"])
    h = jax.nn.relu(h @ params["w_mid"] + params["b_mid"])
    h = h @ params["w_out"] + params["b_out"]
    if sigmoid_output:
        h = jax.nn.sigmoid(h)
    return h[:, None, :].astype(token_embedding.dtype)


if __name__ == "__main__":
    # Small shapes consistent with the module: batch=2, seq=8, input_dim=64, hidden=32
    bs, seq_len, input_dim, hidden = 2, 8, 64, 32

    key = jax.random.PRNGKey(0)
    k_x, k_p, k_x2 = jax.random.split(key, 3)
    x = jax.random.normal(k_x, (bs, seq_len, input_dim), jnp.float32)
    params = init_params(k_p, input_dim, hidden)

    # TODO(synk): only num_layers=3 (one hidden->hidden middle layer) is implemented,
    # matching the module default; other num_layers would need extra weight args.

    prepped = prepare_params(params, seq_len)          # one-time weight prep (cached)

    # --- tiny-batch (unfused) path, with and without sigmoid --------------------
    out = jax.block_until_ready(text_embedding_mlp(x, prepped, sigmoid_output=False))
    ref = reference(x, params, sigmoid_output=False)
    assert out.shape == (bs, 1, hidden), out.shape
    assert jnp.allclose(out, ref, atol=2e-5, rtol=2e-5), "mismatch vs reference"

    out_s = jax.block_until_ready(text_embedding_mlp(x, prepped, sigmoid_output=True))
    ref_s = reference(x, params, sigmoid_output=True)
    assert jnp.allclose(out_s, ref_s, atol=2e-5, rtol=2e-5), "mismatch (sigmoid) vs reference"

    # --- large-batch (fused, gridded, ragged last block) path -------------------
    bs_l = 200
    x_l = jax.random.normal(k_x2, (bs_l, seq_len, input_dim), jnp.float32)
    out_l = jax.block_until_ready(text_embedding_mlp(x_l, prepped, sigmoid_output=False))
    ref_l = reference(x_l, params, sigmoid_output=False)
    assert out_l.shape == (bs_l, 1, hidden), out_l.shape
    assert jnp.allclose(out_l, ref_l, atol=1e-4, rtol=1e-4), "mismatch (large batch) vs reference"

    print("KERNEL_OK")
</pallas_src>

<mosaic_0001>
module attributes {stable_mosaic.version = 11 : i64} {
  func.func @kernel(%arg0: i32, %arg1: memref<2x8x64xf32, #tpu.memory_space<vmem>>, %arg2: memref<64x128xf32, #tpu.memory_space<vmem>>, %arg3: memref<1x128xf32, #tpu.memory_space<vmem>>, %arg4: memref<128x128xf32, #tpu.memory_space<vmem>>, %arg5: memref<1x128xf32, #tpu.memory_space<vmem>>, %arg6: memref<128x128xf32, #tpu.memory_space<vmem>>, %arg7: memref<1x128xf32, #tpu.memory_space<vmem>>, %arg8: memref<2x128xf32, #tpu.memory_space<vmem>>) attributes {dimension_semantics = [#tpu.dimension_semantics<parallel>], iteration_bounds = array<i64: 1>, scalar_prefetch = 0 : i64, scratch_operands = 0 : i64, tpu.core_type = #tpu.core_type<tc>, window_params = [{transform_indices = @transform_0, window_bounds = array<i64: 2, 8, 64>}, {pipeline_mode = #tpu.pipeline_mode<synchronous>, transform_indices = @transform_1, window_bounds = array<i64: 64, 128>}, {pipeline_mode = #tpu.pipeline_mode<synchronous>, transform_indices = @transform_2, window_bounds = array<i64: 1, 128>}, {pipeline_mode = #tpu.pipeline_mode<synchronous>, transform_indices = @transform_3, window_bounds = array<i64: 128, 128>}, {pipeline_mode = #tpu.pipeline_mode<synchronous>, transform_indices = @transform_4, window_bounds = array<i64: 1, 128>}, {pipeline_mode = #tpu.pipeline_mode<synchronous>, transform_indices = @transform_5, window_bounds = array<i64: 128, 128>}, {pipeline_mode = #tpu.pipeline_mode<synchronous>, transform_indices = @transform_6, window_bounds = array<i64: 1, 128>}, {transform_indices = @transform_7, window_bounds = array<i64: 2, 128>}]} {
    %c0 = arith.constant 0 : index
    %c0_0 = arith.constant 0 : index
    %c0_1 = arith.constant 0 : index
    %0 = vector.load %arg1[%c0, %c0_0, %c0_1] : memref<2x8x64xf32, #tpu.memory_space<vmem>>, vector<2x8x64xf32>
    %cst = arith.constant dense<0.000000e+00> : vector<2x64xf32>
    %1 = vector.multi_reduction <add>, %0, %cst [1] : vector<2x8x64xf32> to vector<2x64xf32>
    %c0_2 = arith.constant 0 : index
    %c0_3 = arith.constant 0 : index
    %2 = vector.load %arg2[%c0_2, %c0_3] : memref<64x128xf32, #tpu.memory_space<vmem>>, vector<64x128xf32>
    %cst_4 = arith.constant dense<0.000000e+00> : vector<2x128xf32>
    %3 = tpu.matmul %1, %2, %cst_4 {dimension_numbers = #tpu.dot_dimension_numbers<[1], [0], [0], [1], [0, 0, 1, 1], [], []>} : vector<2x64xf32>, vector<64x128xf32>, vector<2x128xf32> -> vector<2x128xf32>
    %c0_5 = arith.constant 0 : index
    %c0_6 = arith.constant 0 : index
    %4 = vector.load %arg3[%c0_5, %c0_6] : memref<1x128xf32, #tpu.memory_space<vmem>>, vector<1x128xf32>
    %5 = vector.broadcast %4 : vector<1x128xf32> to vector<2x128xf32>
    %6 = arith.addf %3, %5 : vector<2x128xf32>
    %cst_7 = arith.constant 0.000000e+00 : f32
    %7 = vector.broadcast %cst_7 : f32 to vector<2x128xf32>
    %8 = arith.maximumf %6, %7 : vector<2x128xf32>
    %c0_8 = arith.constant 0 : index
    %c0_9 = arith.constant 0 : index
    %9 = vector.load %arg4[%c0_8, %c0_9] : memref<128x128xf32, #tpu.memory_space<vmem>>, vector<128x128xf32>
    %cst_10 = arith.constant dense<0.000000e+00> : vector<2x128xf32>
    %10 = tpu.matmul %8, %9, %cst_10 {dimension_numbers = #tpu.dot_dimension_numbers<[1], [0], [0], [1], [0, 0, 1, 1], [], []>} : vector<2x128xf32>, vector<128x128xf32>, vector<2x128xf32> -> vector<2x128xf32>
    %c0_11 = arith.constant 0 : index
    %c0_12 = arith.constant 0 : index
    %11 = vector.load %arg5[%c0_11, %c0_12] : memref<1x128xf32, #tpu.memory_space<vmem>>, vector<1x128xf32>
    %12 = vector.broadcast %11 : vector<1x128xf32> to vector<2x128xf32>
    %13 = arith.addf %10, %12 : vector<2x128xf32>
    %cst_13 = arith.constant 0.000000e+00 : f32
    %14 = vector.broadcast %cst_13 : f32 to vector<2x128xf32>
    %15 = arith.maximumf %13, %14 : vector<2x128xf32>
    %c0_14 = arith.constant 0 : index
    %c0_15 = arith.constant 0 : index
    %16 = vector.load %arg6[%c0_14, %c0_15] : memref<128x128xf32, #tpu.memory_space<vmem>>, vector<128x128xf32>
    %cst_16 = arith.constant dense<0.000000e+00> : vector<2x128xf32>
    %17 = tpu.matmul %15, %16, %cst_16 {dimension_numbers = #tpu.dot_dimension_numbers<[1], [0], [0], [1], [0, 0, 1, 1], [], []>} : vector<2x128xf32>, vector<128x128xf32>, vector<2x128xf32> -> vector<2x128xf32>
    %c0_17 = arith.constant 0 : index
    %c0_18 = arith.constant 0 : index
    %18 = vector.load %arg7[%c0_17, %c0_18] : memref<1x128xf32, #tpu.memory_space<vmem>>, vector<1x128xf32>
    %19 = vector.broadcast %18 : vector<1x128xf32> to vector<2x128xf32>
    %20 = arith.addf %17, %19 : vector<2x128xf32>
    %c0_19 = arith.constant 0 : index
    %c0_20 = arith.constant 0 : index
    %21 = vector.load %arg8[%c0_19, %c0_20] : memref<2x128xf32, #tpu.memory_space<vmem>>, vector<2x128xf32>
    tpu.vector_store %arg8[%c0_19, %c0_20], %20 {strides = array<i32>} : memref<2x128xf32, #tpu.memory_space<vmem>>, vector<2x128xf32>,
    return
  }
  func.func @transform_0(%arg0: i32) -> (i32, i32, i32) {
    %c0_i32 = arith.constant 0 : i32
    %c0_i32_0 = arith.constant 0 : i32
    %c0_i32_1 = arith.constant 0 : i32
    return %arg0, %c0_i32, %c0_i32_0 : i32, i32, i32
  }
  func.func @transform_1(%arg0: i32) -> (i32, i32) {
    %c0_i32 = arith.constant 0 : i32
    %c0_i32_0 = arith.constant 0 : i32
    %c0_i32_1 = arith.constant 0 : i32
    return %c0_i32, %c0_i32_0 : i32, i32
  }
  func.func @transform_2(%arg0: i32) -> (i32, i32) {
    %c0_i32 = arith.constant 0 : i32
    %c0_i32_0 = arith.constant 0 : i32
    %c0_i32_1 = arith.constant 0 : i32
    return %c0_i32, %c0_i32_0 : i32, i32
  }
  func.func @transform_3(%arg0: i32) -> (i32, i32) {
    %c0_i32 = arith.constant 0 : i32
    %c0_i32_0 = arith.constant 0 : i32
    %c0_i32_1 = arith.constant 0 : i32
    return %c0_i32, %c0_i32_0 : i32, i32
  }
  func.func @transform_4(%arg0: i32) -> (i32, i32) {
    %c0_i32 = arith.constant 0 : i32
    %c0_i32_0 = arith.constant 0 : i32
    %c0_i32_1 = arith.constant 0 : i32
    return %c0_i32, %c0_i32_0 : i32, i32
  }
  func.func @transform_5(%arg0: i32) -> (i32, i32) {
    %c0_i32 = arith.constant 0 : i32
    %c0_i32_0 = arith.constant 0 : i32
    %c0_i32_1 = arith.constant 0 : i32
    return %c0_i32, %c0_i32_0 : i32, i32
  }
  func.func @transform_6(%arg0: i32) -> (i32, i32) {
    %c0_i32 = arith.constant 0 : i32
    %c0_i32_0 = arith.constant 0 : i32
    %c0_i32_1 = arith.constant 0 : i32
    return %c0_i32, %c0_i32_0 : i32, i32
  }
  func.func @transform_7(%arg0: i32) -> (i32, i32) {
    %c0_i32 = arith.constant 0 : i32
    %c0_i32_0 = arith.constant 0 : i32
    return %arg0, %c0_i32 : i32, i32
  }
}

</mosaic_0001>

<bundles_post_ra>
// kernel: tpu_custom_call.1
= control target key start
LH: loop header
LB: loop body
LE: loop exit
PB: predicated region body
PF: predicated region fallthrough
CT: control target
= control target key end

     0   :  { %12 = vsyncpa [#allocation3], 0  ;;  %s783_s0 = inlined_call_operand.hbm [shape: f32[2,8,64], index: 0, kind: input, shape index: {}]   ;;  %s784_s1 = inlined_call_operand.hbm [shape: f32[64,128], index: 1, kind: input, shape index: {}]   ;;  %s785_s2 = inlined_call_operand.vmem [shape: f32[1,128], index: 2, kind: input, shape index: {}]   ;;  %s786_s3 = inlined_call_operand.hbm [shape: f32[128,128], index: 3, kind: input, shape index: {}]   ;;  %s787_s4 = inlined_call_operand.vmem [shape: f32[1,128], index: 4, kind: input, shape index: {}]   ;;  %s788_s5 = inlined_call_operand.hbm [shape: f32[128,128], index: 5, kind: input, shape index: {}]   ;;  %s789_s6 = inlined_call_operand.vmem [shape: f32[1,128], index: 6, kind: input, shape index: {}]   ;;  %s790_s7 = inlined_call_operand.hbm [shape: f32[2,128], index: 7, kind: output, shape index: {}]  }
   0x1   :  { %13 = vsyncpa [#allocation6], 0 }
   0x2   :  { %14 = vsyncpa [#allocation9], 0 }
   0x3   :  { %15 = vsyncpa [#allocation4], 0  ;;  %s649_s24 = smov [#allocation5]   ;;  %s650_s26 = smov [#allocation2]  }
   0x4   :  { %s33_s25 = sshll.u32 %s649_s24, 4  ;;  %s21_s27 = sshll.u32 %s650_s26, 4  ;;  %s34_s25 = int_to_ptr.vmem [resolvable:$true] %s33_s25  ;;  %s22_s27 = int_to_ptr.vmem [resolvable:$true] %s21_s27 }
   0x5   :  { %s549_s28 = scalar_lea.vmem %s34_s25, 1024  ;;  %p554_p1 = scmp.lt.s32.totalorder %s34_s25, %s34_s25 }
   0x6   :  { %p550_p0 = scmp.ne.s32.totalorder %s34_s25, %s549_s28  ;;  %p555_p2 = scmp.lt.s32.totalorder %s549_s28, %s549_s28 }
   0x8   :  { %p556_p3 = por %p555_p2, %p554_p1 }
   0xa   :  { %p557_p4 = pnand %p556_p3, %p550_p0 }
   0xc   :  { %560 = shalt.err (!%p557_p4)
}
   0xd   :  { %s651_s29 = smov 128   ;;  %s652_s30 = smov 8  }
   0xe   :  { %39 = dma.hbm_to_vmem [thread:$0]  %s784_s1, 1024, %s34_s25, [#allocation6], %s651_s29, %s651_s29, %s652_s30  }
   0xf   :  { %s569_s10 = scalar_lea.vmem %s22_s27, 256  ;;  %p574_p6 = scmp.lt.s32.totalorder %s22_s27, %s22_s27 }
  0x10   :  { %p570_p5 = scmp.ne.s32.totalorder %s22_s27, %s569_s10  ;;  %p575_p7 = scmp.lt.s32.totalorder %s569_s10, %s569_s10 }
  0x12   :  { %p576_p8 = por %p575_p7, %p574_p6 }
  0x14   :  { %p577_p9 = pnand %p576_p8, %p570_p5 }
  0x16   :  { %580 = shalt.err (!%p577_p9)
}
  0x17   :  { %27 = dma.hbm_to_vmem [thread:$0]  %s783_s0, 256, %s22_s27, [#allocation3], %s651_s29, %s651_s29, %s652_s30  }
  0x18   :  { %s653_s13 = smov [#allocation7]   ;;  %s654_s15 = smov [#allocation8]  }
  0x19   :  { %s47_s14 = sshll.u32 %s653_s13, 4  ;;  %s61_s16 = sshll.u32 %s654_s15, 4  ;;  %s48_s14 = int_to_ptr.vmem [resolvable:$true] %s47_s14  ;;  %s62_s16 = int_to_ptr.vmem [resolvable:$true] %s61_s16 }
  0x1a   :  { %s589_s1 = scalar_lea.vmem %s48_s14, 2048  ;;  %p594_p11 = scmp.lt.s32.totalorder %s48_s14, %s48_s14 }
  0x1b   :  { %p590_p10 = scmp.ne.s32.totalorder %s48_s14, %s589_s1  ;;  %p595_p12 = scmp.lt.s32.totalorder %s589_s1, %s589_s1 }
  0x1d   :  { %p596_p13 = por %p595_p12, %p594_p11 }
  0x1f   :  { %p597_p0 = pnand %p596_p13, %p590_p10 }
  0x21   :  { %600 = shalt.err (!%p597_p0)
}
  0x22   :  { %53 = dma.hbm_to_vmem [thread:$0]  %s786_s3, 2048, %s48_s14, [#allocation6], %s651_s29, %s651_s29, %s652_s30  }
  0x23   :  { %s609_s0 = scalar_lea.vmem %s62_s16, 2048  ;;  %p614_p2 = scmp.lt.s32.totalorder %s62_s16, %s62_s16 }
  0x24   :  { %p610_p1 = scmp.ne.s32.totalorder %s62_s16, %s609_s0  ;;  %p615_p3 = scmp.lt.s32.totalorder %s609_s0, %s609_s0 }
  0x26   :  { %p616_p4 = por %p615_p3, %p614_p2 }
  0x28   :  { %p617_p5 = pnand %p616_p4, %p610_p1 }
  0x2a   :  { %620 = shalt.err (!%p617_p5)
}
  0x2b   :  { %67 = dma.hbm_to_vmem [thread:$0]  %s788_s5, 2048, %s62_s16, [#allocation9], %s651_s29, %s651_s29, %s652_s30  }
  0x2c   :  { %641 = dma.done.wait [#allocation3], 256  }
  0x2d   :  { %642 = vsyncadd [#allocation3], 4294967040 }
  0x2e   :  { %643 = dma.done.wait [#allocation6], 3072  }
  0x2f   :  { %644 = vsyncadd [#allocation6], 4294964224 }
  0x30   :  { %645 = dma.done.wait [#allocation9], 2048  }
  0x31   :  { %646 = vsyncadd [#allocation9], 4294965248  ;;  %v655_v0 = vmov 0.0   ;;  %vm656_vm0 = vmmov 0   ;;  %v106_v1 = vld [vmem:[#allocation5 + $0x38] sm:$0xff]  ;;  %v105_v2 = vld [vmem:[#allocation5 + $0x30] sm:$0xff] }
  0x32   :  { %443 = vmatprep.subr.mxu0 %v655_v0  ;;  %459 = vmatprep.mubr.msk.f32.mxu0 %vm656_vm0, %v655_v0  ;;  %vm84_vm1 = vcmask 523264   ;;  %v104_v3 = vld [vmem:[#allocation5 + $0x28] sm:$0xff]  ;;  %v82_v4 = vld [vmem:[#allocation2] sm:$0xff]  ;;  %v83_v5 = vld [vmem:[#allocation2 + $0x8] sm:$0xff]  ;;  %vm116_vm2 = vcmask 1041409   ;;  %s657_s24 = smov [#allocation10]  }
  0x33   :  { %462 = vmatprep.subr.mxu1 %v655_v0  ;;  %494 = vmatprep.mubr.msk.f32.mxu1 %vm656_vm0, %v655_v0  ;;  %v85_v6 = vsel %vm84_vm1, %v82_v4, 0.0  ;;  %v206_v7 = vld [vmem:[#allocation7 + $0x78] sm:$0xff]  ;;  %v205_v8 = vld [vmem:[#allocation7 + $0x70] sm:$0xff]  ;;  %v103_v9 = vld [vmem:[#allocation5 + $0x20] sm:$0xff]  ;;  %v92_v11 = vsel %vm84_vm1, %v83_v5, 0.0  ;;  %s385_s25 = sshll.u32 %s657_s24, 4  ;;  %s386_s25 = int_to_ptr.vmem [resolvable:$true] %s385_s25 }
  0x34   :  { %444 = vmatpush3.msra.mxu0 %v106_v1  ;;  %v86_v10 = vrot.slane %v85_v6, 4  ;;  %463 = vmatpush3.msra.mxu1 %v206_v7  ;;  %v93_v12 = vrot.slane %v92_v11, 4  ;;  %v204_v13 = vld [vmem:[#allocation7 + $0x68] sm:$0xff]  ;;  %v102_v14 = vld [vmem:[#allocation5 + $0x18] sm:$0xff]  ;;  %v203_v17 = vld [vmem:[#allocation7 + $0x60] sm:$0xff]  ;;  %s621_s26 = scalar_lea.vmem %s386_s25, 32  ;;  %p626_p7 = scmp.lt.s32.totalorder %s386_s25, %s386_s25 }
  0x35   :  { %445 = vmatprep.subr.mxu0 %v655_v0  ;;  %464 = vmatprep.subr.mxu1 %v655_v0  ;;  %v101_v18 = vld [vmem:[#allocation5 + $0x10] sm:$0xff]  ;;  %v202_v21 = vld [vmem:[#allocation7 + $0x58] sm:$0xff]  ;;  %v100_v22 = vld [vmem:[#allocation5 + $0x8] sm:$0xff]  ;;  %p622_p6 = scmp.ne.s32.totalorder %s386_s25, %s621_s26  ;;  %p627_p8 = scmp.lt.s32.totalorder %s621_s26, %s621_s26 }
  0x36   :  { %446 = vmatpush3.msra.mxu0 %v105_v2  ;;  %v87_v15 = vadd.f32 %v86_v10, %v85_v6  ;;  %465 = vmatpush3.msra.mxu1 %v205_v8  ;;  %v94_v16 = vadd.f32 %v93_v12, %v92_v11  ;;  %v201_v25 = vld [vmem:[#allocation7 + $0x50] sm:$0xff]  ;;  %v99_v26 = vld [vmem:[#allocation5] sm:$0xff]  ;;  %v200_v29 = vld [vmem:[#allocation7 + $0x48] sm:$0xff] }
  0x37   :  { %447 = vmatprep.subr.mxu0 %v655_v0  ;;  %466 = vmatprep.subr.mxu1 %v655_v0  ;;  %v199_v32 = vld [vmem:[#allocation7 + $0x40] sm:$0xff]  ;;  %v198_v34 = vld [vmem:[#allocation7 + $0x38] sm:$0xff]  ;;  %v197_v35 = vld [vmem:[#allocation7 + $0x30] sm:$0xff]  ;;  %p628_p9 = por %p627_p8, %p626_p7 }
  0x38   :  { %448 = vmatpush3.msra.mxu0 %v104_v3  ;;  %v88_v19 = vrot.slane %v87_v15, 2  ;;  %467 = vmatpush3.msra.mxu1 %v204_v13  ;;  %v95_v20 = vrot.slane %v94_v16, 2  ;;  %v196_v36 = vld [vmem:[#allocation7 + $0x28] sm:$0xff]  ;;  %v195_v37 = vld [vmem:[#allocation7 + $0x20] sm:$0xff]  ;;  %v194_v38 = vld [vmem:[#allocation7 + $0x18] sm:$0xff] }
  0x39   :  { %449 = vmatprep.subr.mxu0 %v655_v0  ;;  %468 = vmatprep.subr.mxu1 %v655_v0  ;;  %v193_v39 = vld [vmem:[#allocation7 + $0x10] sm:$0xff]  ;;  %v192_v40 = vld [vmem:[#allocation7 + $0x8] sm:$0xff]  ;;  %v191_v41 = vld [vmem:[#allocation7] sm:$0xff]  ;;  %p629_p10 = pnand %p628_p9, %p622_p6 }
  0x3a   :  { %450 = vmatpush3.msra.mxu0 %v103_v9  ;;  %v89_v23 = vadd.f32 %v88_v19, %v87_v15  ;;  %469 = vmatpush3.msra.mxu1 %v203_v17  ;;  %v96_v24 = vadd.f32 %v95_v20, %v94_v16  ;;  %v300_v42 = vld [vmem:[#allocation8 + $0x78] sm:$0xff]  ;;  %v299_v43 = vld [vmem:[#allocation8 + $0x70] sm:$0xff]  ;;  %v298_v44 = vld [vmem:[#allocation8 + $0x68] sm:$0xff] }
  0x3b   :  { %451 = vmatprep.subr.mxu0 %v655_v0  ;;  %470 = vmatprep.subr.mxu1 %v655_v0  ;;  %v297_v45 = vld [vmem:[#allocation8 + $0x60] sm:$0xff]  ;;  %v296_v46 = vld [vmem:[#allocation8 + $0x58] sm:$0xff]  ;;  %v295_v47 = vld [vmem:[#allocation8 + $0x50] sm:$0xff] }
  0x3c   :  { %452 = vmatpush3.msra.mxu0 %v102_v14  ;;  %v90_v27 = vrot.slane %v89_v23, 1  ;;  %471 = vmatpush3.msra.mxu1 %v202_v21  ;;  %v97_v28 = vrot.slane %v96_v24, 1  ;;  %v294_v48 = vld [vmem:[#allocation8 + $0x48] sm:$0xff]  ;;  %v293_v49 = vld [vmem:[#allocation8 + $0x40] sm:$0xff]  ;;  %v292_v50 = vld [vmem:[#allocation8 + $0x38] sm:$0xff] }
  0x3d   :  { %453 = vmatprep.subr.mxu0 %v655_v0  ;;  %472 = vmatprep.subr.mxu1 %v655_v0  ;;  %v291_v51 = vld [vmem:[#allocation8 + $0x30] sm:$0xff]  ;;  %v290_v52 = vld [vmem:[#allocation8 + $0x28] sm:$0xff]  ;;  %v289_v53 = vld [vmem:[#allocation8 + $0x20] sm:$0xff] }
  0x3e   :  { %454 = vmatpush3.msra.mxu0 %v101_v18  ;;  %v91_v30 = vadd.f32 %v90_v27, %v89_v23  ;;  %473 = vmatpush3.msra.mxu1 %v201_v25  ;;  %v98_v31 = vadd.f32 %v97_v28, %v96_v24  ;;  %v288_v54 = vld [vmem:[#allocation8 + $0x18] sm:$0xff]  ;;  %v396_v55 = vld [vmem:[%s785_s2] ss:$0 sm:$0xff]  ;;  %v286_v61 = vld [vmem:[#allocation8 + $0x8] sm:$0xff] }
  0x3f   :  { %455 = vmatprep.subr.mxu0 %v655_v0  ;;  %474 = vmatprep.subr.mxu1 %v655_v0  ;;  %v287_v60 = vld [vmem:[#allocation8 + $0x10] sm:$0xff]  ;;  %v285_v62 = vld [vmem:[#allocation8] sm:$0xff] }
  0x40   :  { %456 = vmatpush3.msra.mxu0 %v100_v22  ;;  %475 = vmatpush3.msra.mxu1 %v200_v29  ;;  %v117_v33 = vsel %vm116_vm2, %v98_v31, %v91_v30  ;;  %v398_v63 = vld [vmem:[%s787_s4] ss:$0 sm:$0xff] }
  0x41   :  { %457 = vmatprep.subr.mxu0 %v655_v0  ;;  %476 = vmatprep.subr.mxu1 %v655_v0  ;;  %v399_v5 = vld [vmem:[%s789_s6] ss:$0 sm:$0xff] }
  0x42   :  { %458 = vmatpush3.msra.mxu0 %v99_v26  ;;  %477 = vmatpush3.msra.mxu1 %v199_v32 }
  0x43   :  { %497 = vmatprep.subr.mxu0 %v655_v0  ;;  %460 = vmatmul.mubr.msk.f32.vlgmr.msra.gmra.mxu0 %vm84_vm1, %v117_v33 }
  0x44   :  { %478 = vmatprep.subr.mxu1 %v655_v0  ;;  %529 = vmatprep.mubr.msk.f32.mxu0 %vm656_vm0, %v655_v0 }
  0x45   :  { %479 = vmatpush3.msra.mxu1 %v198_v34  ;;  %498 = vmatpush3.msra.mxu0 %v300_v42 }
  0x46   :  { %480 = vmatprep.subr.mxu1 %v655_v0  ;;  %499 = vmatprep.subr.mxu0 %v655_v0 }
  0x47   :  { %481 = vmatpush3.msra.mxu1 %v197_v35  ;;  %500 = vmatpush3.msra.mxu0 %v299_v43 }
  0x48   :  { %482 = vmatprep.subr.mxu1 %v655_v0  ;;  %501 = vmatprep.subr.mxu0 %v655_v0 }
  0x49   :  { %483 = vmatpush3.msra.mxu1 %v196_v36  ;;  %502 = vmatpush3.msra.mxu0 %v298_v44 }
  0x4a   :  { %484 = vmatprep.subr.mxu1 %v655_v0  ;;  %503 = vmatprep.subr.mxu0 %v655_v0 }
  0x4b   :  { %485 = vmatpush3.msra.mxu1 %v195_v37  ;;  %504 = vmatpush3.msra.mxu0 %v297_v45 }
  0x4c   :  { %486 = vmatprep.subr.mxu1 %v655_v0  ;;  %505 = vmatprep.subr.mxu0 %v655_v0 }
  0x4d   :  { %487 = vmatpush3.msra.mxu1 %v194_v38  ;;  %506 = vmatpush3.msra.mxu0 %v296_v46 }
  0x4e   :  { %488 = vmatprep.subr.mxu1 %v655_v0  ;;  %507 = vmatprep.subr.mxu0 %v655_v0 }
  0x4f   :  { %489 = vmatpush3.msra.mxu1 %v193_v39  ;;  %508 = vmatpush3.msra.mxu0 %v295_v47 }
  0x50   :  { %490 = vmatprep.subr.mxu1 %v655_v0  ;;  %509 = vmatprep.subr.mxu0 %v655_v0 }
  0x51   :  { %491 = vmatpush3.msra.mxu1 %v192_v40  ;;  %510 = vmatpush3.msra.mxu0 %v294_v48 }
  0x52   :  { %492 = vmatprep.subr.mxu1 %v655_v0  ;;  %511 = vmatprep.subr.mxu0 %v655_v0 }
  0x53   :  { %493 = vmatpush3.msra.mxu1 %v191_v41  ;;  %512 = vmatpush3.msra.mxu0 %v293_v49 }
  0x54   :  { %513 = vmatprep.subr.mxu0 %v655_v0 }
  0x55   :  { %514 = vmatpush3.msra.mxu0 %v292_v50 }
  0x56   :  { %515 = vmatprep.subr.mxu0 %v655_v0 }
  0x57   :  { %516 = vmatpush3.msra.mxu0 %v291_v51 }
  0x58   :  { %517 = vmatprep.subr.mxu0 %v655_v0 }
  0x59   :  { %518 = vmatpush3.msra.mxu0 %v290_v52 }
  0x5a   :  { %519 = vmatprep.subr.mxu0 %v655_v0 }
  0x5b   :  { %520 = vmatpush3.msra.mxu0 %v289_v53 }
  0x5c   :  { %521 = vmatprep.subr.mxu0 %v655_v0 }
  0x5d   :  { %522 = vmatpush3.msra.mxu0 %v288_v54 }
  0x5e   :  { %523 = vmatprep.subr.mxu0 %v655_v0 }
  0x5f   :  { %524 = vmatpush3.msra.mxu0 %v287_v60 }
  0x60   :  { %525 = vmatprep.subr.mxu0 %v655_v0 }
  0x61   :  { %526 = vmatpush3.msra.mxu0 %v286_v61 }
  0x62   :  { %527 = vmatprep.subr.mxu0 %v655_v0 }
  0x63   :  { %528 = vmatpush3.msra.mxu0 %v285_v62 }
 0x103   :  { %v186_v56 = vpop.f32.mrf.mxu0 }
 0x104   :  { %v187_v57 = vadd.f32 %v396_v55, %v186_v56 }
 0x105   :  { %v461_v58 = vpop.f32.mrf.mxu0 }
 0x106   :  { %v190_v59 = vmax.f32 %v187_v57, 0.0 }
 0x108   :  { %495 = vmatmul.mubr.f32.vlgmr.msra.gmra.mxu1 %v190_v59 }
 0x1c8   :  { %v280_v1 = vpop.f32.mrf.mxu1 }
 0x1c9   :  { %v281_v2 = vadd.f32 %v398_v63, %v280_v1 }
 0x1ca   :  { %v496_v3 = vpop.f32.mrf.mxu1 }
 0x1cb   :  { %v284_v4 = vmax.f32 %v281_v2, 0.0 }
 0x1cd   :  { %530 = vmatmul.mubr.f32.vlgmr.msra.gmra.mxu0 %v284_v4 }
 0x28d   :  { %v374_v6 = vpop.f32.mrf.mxu0 }
 0x28e   :  { %v375_v7 = vadd.f32 %v399_v5, %v374_v6 }
 0x28f   :  { %v531_v0 = vpop.f32.mrf.mxu0 }
 0x290   :  { %378 = vst [vmem:[#allocation10] sm:$0x3] %v375_v7 }
 0x291   :  { %632 = shalt.err (!%p629_p10)
}
 0x292   :  { %388 = dma.vmem_to_hbm [thread:$0]  %s386_s25, 32, %s790_s7, [#allocation4]  }
 0x293   :  { %647 = dma.done.wait [#allocation4], 32  }
 0x294   :  { %648 = vsyncadd [#allocation4], 4294967264 }
 0x295   :  { %392 = vsyncpa [#allocation3], 1 }
 0x296   :  { %393 = vsyncpa [#allocation6], 1 }
 0x297   :  { %394 = vsyncpa [#allocation9], 1 }
 0x298   :  { %395 = vsyncpa [#allocation4], 1 }

</bundles_post_ra>
